<compile_context>
chip_gen: v7x
topology: tpu7x:2x2x1
jax: 0.10.0
libtpu: 0.0.40
codegen_flags: <defaults>
</compile_context>

<pallas_src>
import jax
import jax.numpy as jnp
from jax.experimental import pallas as pl
from jax.experimental.pallas import tpu as pltpu

_INV_SQRT2 = 0.7071067811865476
_TILE_FACTOR = 416   # last-dim replication factor implied by the concat chain
_NUM_GELU = 6        # gelu nesting depth of every output element
_TARGET_BLOCK_BYTES = 2 << 20  # ~2 MiB output tile per buffer (v7x-safe)


def _exact_gelu(v):
    # torch.nn.functional.gelu default: 0.5 * x * (1 + erf(x / sqrt(2)))
    return 0.5 * v * (1.0 + jax.lax.erf(v * _INV_SQRT2))


def _replicate_last(v, reps):
    """Replicate `v` `reps` times along the last axis with O(log reps) concats.

    All pieces hold the same D-periodic content, so concat order is irrelevant
    to the resulting values. Lane-axis concatenation lowers cleanly in Mosaic.
    """
    pieces = []
    w = v
    r = int(reps)
    while True:
        if r & 1:
            pieces.append(w)
        r >>= 1
        if r == 0:
            break
        w = jnp.concatenate([w, w], axis=-1)
    return pieces[0] if len(pieces) == 1 else jnp.concatenate(pieces, axis=-1)


def _gelu6_replicate_kernel(x_ref, o_ref):
    # x_ref: (ROWS, D) block of the flattened input
    # o_ref: (ROWS, 416*D) matching lane-dense block of the flattened output
    v = x_ref[...].astype(jnp.float32)
    for _ in range(_NUM_GELU):
        v = _exact_gelu(v)
    rep = _replicate_last(v, _TILE_FACTOR)
    o_ref[...] = rep.astype(o_ref.dtype)


def _pick_row_block(n_rows, out_row_bytes):
    """Rows per grid step.

    Must divide n_rows and be a multiple of 8 (or the full extent, which
    sidesteps the (8,128) divisibility rule for small inputs). Sized so one
    output tile is ~_TARGET_BLOCK_BYTES.
    """
    if n_rows % 8 != 0:
        return n_rows
    rows = _TARGET_BLOCK_BYTES // max(out_row_bytes, 1)
    rows = int(min(n_rows, max(8, (rows // 8) * 8)))
    while n_rows % rows != 0:
        rows -= 8
    return max(rows, 8)


@jax.jit
def model_forward(x1: jax.Array) -> jax.Array:
    """Equivalent of Model.forward. x1: (B, R, D) -> (B, R, 416*D)."""
    b, r, d = x1.shape
    n = b * r
    out_width = _TILE_FACTOR * d

    x2d = x1.reshape(n, d)  # free row-major reshape; lane-dense layout
    row_blk = _pick_row_block(n, out_width * x1.dtype.itemsize)
    grid = (n // row_blk,)

    out2d = pl.pallas_call(
        _gelu6_replicate_kernel,
        out_shape=jax.ShapeDtypeStruct((n, out_width), x1.dtype),
        grid_spec=pltpu.PrefetchScalarGridSpec(
            num_scalar_prefetch=0,
            grid=grid,
            in_specs=[pl.BlockSpec((row_blk, d), lambda i: (i, 0))],
            out_specs=pl.BlockSpec((row_blk, out_width), lambda i: (i, 0)),
        ),
        compiler_params=pltpu.CompilerParams(
            dimension_semantics=("parallel",),
        ),
    )(x2d)

    return out2d.reshape(b, r, out_width)


def _reference(x1: jax.Array) -> jax.Array:
    # Pure-JAX mirror of the literal PyTorch graph, for a correctness check.
    g = lambda t: 0.5 * t * (1.0 + jax.lax.erf(t * _INV_SQRT2))
    x2 = jnp.concatenate([g(x1), g(x1)], axis=-1)
    x3 = jnp.concatenate([g(x2), g(x2)], axis=-1)
    x4 = jnp.concatenate([g(x3), g(x3)], axis=-1)
    x5 = jnp.concatenate([g(x4), g(x4)], axis=-1)
    x6 = jnp.concatenate([g(x5), g(x5)], axis=-1)
    x = x6
    for _ in range(11):  # x7 .. x17
        x = jnp.concatenate([x, g(x5)], axis=-1)
    x18 = jnp.concatenate([g(x), g(x)], axis=-1)
    return x18


if __name__ == "__main__":
    key = jax.random.PRNGKey(0)
    # Same shape as the module's example input: (1, 2, 2)
    x1 = jax.random.normal(key, (1, 2, 2), dtype=jnp.float32)

    out = jax.block_until_ready(model_forward(x1))

    ref = _reference(x1)
    assert out.shape == ref.shape == (1, 2, 2 * _TILE_FACTOR), out.shape
    assert jnp.allclose(out, ref, atol=1e-6, rtol=1e-6)

    print("KERNEL_OK")
</pallas_src>

<mosaic_0001>
module attributes {stable_mosaic.version = 11 : i64} {
  func.func @_gelu6_replicate_kernel(%arg0: i32, %arg1: memref<2x2xf32, #tpu.memory_space<vmem>>, %arg2: memref<2x832xf32, #tpu.memory_space<vmem>>) attributes {dimension_semantics = [#tpu.dimension_semantics<parallel>], iteration_bounds = array<i64: 1>, scalar_prefetch = 0 : i64, scratch_operands = 0 : i64, tpu.core_type = #tpu.core_type<tc>, window_params = [{transform_indices = @transform_0, window_bounds = array<i64: 2, 2>}, {transform_indices = @transform_1, window_bounds = array<i64: 2, 832>}]} {
    %c0 = arith.constant 0 : index
    %c0_0 = arith.constant 0 : index
    %0 = vector.load %arg1[%c0, %c0_0] : memref<2x2xf32, #tpu.memory_space<vmem>>, vector<2x2xf32>
    %cst = arith.constant 5.000000e-01 : f32
    %1 = vector.broadcast %cst : f32 to vector<2x2xf32>
    %2 = arith.mulf %1, %0 : vector<2x2xf32>
    %cst_1 = arith.constant 0.707106769 : f32
    %3 = vector.broadcast %cst_1 : f32 to vector<2x2xf32>
    %4 = arith.mulf %0, %3 : vector<2x2xf32>
    %5 = math.erf %4 : vector<2x2xf32>
    %cst_2 = arith.constant 1.000000e+00 : f32
    %6 = vector.broadcast %cst_2 : f32 to vector<2x2xf32>
    %7 = arith.addf %6, %5 : vector<2x2xf32>
    %8 = arith.mulf %2, %7 : vector<2x2xf32>
    %cst_3 = arith.constant 5.000000e-01 : f32
    %9 = vector.broadcast %cst_3 : f32 to vector<2x2xf32>
    %10 = arith.mulf %9, %8 : vector<2x2xf32>
    %cst_4 = arith.constant 0.707106769 : f32
    %11 = vector.broadcast %cst_4 : f32 to vector<2x2xf32>
    %12 = arith.mulf %8, %11 : vector<2x2xf32>
    %13 = math.erf %12 : vector<2x2xf32>
    %cst_5 = arith.constant 1.000000e+00 : f32
    %14 = vector.broadcast %cst_5 : f32 to vector<2x2xf32>
    %15 = arith.addf %14, %13 : vector<2x2xf32>
    %16 = arith.mulf %10, %15 : vector<2x2xf32>
    %cst_6 = arith.constant 5.000000e-01 : f32
    %17 = vector.broadcast %cst_6 : f32 to vector<2x2xf32>
    %18 = arith.mulf %17, %16 : vector<2x2xf32>
    %cst_7 = arith.constant 0.707106769 : f32
    %19 = vector.broadcast %cst_7 : f32 to vector<2x2xf32>
    %20 = arith.mulf %16, %19 : vector<2x2xf32>
    %21 = math.erf %20 : vector<2x2xf32>
    %cst_8 = arith.constant 1.000000e+00 : f32
    %22 = vector.broadcast %cst_8 : f32 to vector<2x2xf32>
    %23 = arith.addf %22, %21 : vector<2x2xf32>
    %24 = arith.mulf %18, %23 : vector<2x2xf32>
    %cst_9 = arith.constant 5.000000e-01 : f32
    %25 = vector.broadcast %cst_9 : f32 to vector<2x2xf32>
    %26 = arith.mulf %25, %24 : vector<2x2xf32>
    %cst_10 = arith.constant 0.707106769 : f32
    %27 = vector.broadcast %cst_10 : f32 to vector<2x2xf32>
    %28 = arith.mulf %24, %27 : vector<2x2xf32>
    %29 = math.erf %28 : vector<2x2xf32>
    %cst_11 = arith.constant 1.000000e+00 : f32
    %30 = vector.broadcast %cst_11 : f32 to vector<2x2xf32>
    %31 = arith.addf %30, %29 : vector<2x2xf32>
    %32 = arith.mulf %26, %31 : vector<2x2xf32>
    %cst_12 = arith.constant 5.000000e-01 : f32
    %33 = vector.broadcast %cst_12 : f32 to vector<2x2xf32>
    %34 = arith.mulf %33, %32 : vector<2x2xf32>
    %cst_13 = arith.constant 0.707106769 : f32
    %35 = vector.broadcast %cst_13 : f32 to vector<2x2xf32>
    %36 = arith.mulf %32, %35 : vector<2x2xf32>
    %37 = math.erf %36 : vector<2x2xf32>
    %cst_14 = arith.constant 1.000000e+00 : f32
    %38 = vector.broadcast %cst_14 : f32 to vector<2x2xf32>
    %39 = arith.addf %38, %37 : vector<2x2xf32>
    %40 = arith.mulf %34, %39 : vector<2x2xf32>
    %cst_15 = arith.constant 5.000000e-01 : f32
    %41 = vector.broadcast %cst_15 : f32 to vector<2x2xf32>
    %42 = arith.mulf %41, %40 : vector<2x2xf32>
    %cst_16 = arith.constant 0.707106769 : f32
    %43 = vector.broadcast %cst_16 : f32 to vector<2x2xf32>
    %44 = arith.mulf %40, %43 : vector<2x2xf32>
    %45 = math.erf %44 : vector<2x2xf32>
    %cst_17 = arith.constant 1.000000e+00 : f32
    %46 = vector.broadcast %cst_17 : f32 to vector<2x2xf32>
    %47 = arith.addf %46, %45 : vector<2x2xf32>
    %48 = arith.mulf %42, %47 : vector<2x2xf32>
    %49 = tpu.concatenate %48, %48 in 1 : vector<2x2xf32>, vector<2x2xf32> -> vector<2x4xf32>
    %50 = tpu.concatenate %49, %49 in 1 : vector<2x4xf32>, vector<2x4xf32> -> vector<2x8xf32>
    %51 = tpu.concatenate %50, %50 in 1 : vector<2x8xf32>, vector<2x8xf32> -> vector<2x16xf32>
    %52 = tpu.concatenate %51, %51 in 1 : vector<2x16xf32>, vector<2x16xf32> -> vector<2x32xf32>
    %53 = tpu.concatenate %52, %52 in 1 : vector<2x32xf32>, vector<2x32xf32> -> vector<2x64xf32>
    %54 = tpu.concatenate %53, %53 in 1 : vector<2x64xf32>, vector<2x64xf32> -> vector<2x128xf32>
    %55 = tpu.concatenate %54, %54 in 1 : vector<2x128xf32>, vector<2x128xf32> -> vector<2x256xf32>
    %56 = tpu.concatenate %55, %55 in 1 : vector<2x256xf32>, vector<2x256xf32> -> vector<2x512xf32>
    %57 = tpu.concatenate %53, %55, %56 in 1 : vector<2x64xf32>, vector<2x256xf32>, vector<2x512xf32> -> vector<2x832xf32>
    %c0_18 = arith.constant 0 : index
    %c0_19 = arith.constant 0 : index
    %58 = vector.load %arg2[%c0_18, %c0_19] : memref<2x832xf32, #tpu.memory_space<vmem>>, vector<2x832xf32>
    tpu.vector_store %arg2[%c0_18, %c0_19], %57 {strides = array<i32>} : memref<2x832xf32, #tpu.memory_space<vmem>>, vector<2x832xf32>,
    return
  }
  func.func @transform_0(%arg0: i32) -> (i32, i32) {
    %c0_i32 = arith.constant 0 : i32
    %c0_i32_0 = arith.constant 0 : i32
    return %arg0, %c0_i32 : i32, i32
  }
  func.func @transform_1(%arg0: i32) -> (i32, i32) {
    %c0_i32 = arith.constant 0 : i32
    %c0_i32_0 = arith.constant 0 : i32
    return %arg0, %c0_i32 : i32, i32
  }
}

</mosaic_0001>

<bundles_post_ra>
// kernel: model_forward.1
= control target key start
LH: loop header
LB: loop body
LE: loop exit
PB: predicated region body
PF: predicated region fallthrough
CT: control target
= control target key end

     0   :  { %s216_s0 = inlined_call_operand.vmem [shape: f32[2,2], index: 0, kind: input, shape index: {}]   ;;  %s217_s1 = inlined_call_operand.hbm [shape: f32[2,832], index: 1, kind: output, shape index: {}]  }
   0x1   :  { %v9_v0 = vld [vmem:[%s216_s0] sm:$0x3] }
   0x2   :  { %6 = vsyncpa [#allocation3], 0  ;;  %v11_v1 = vmul.f32 0.70710677, %v9_v0  ;;  %v10_v2 = vmul.f32 0.5, %v9_v0  ;;  %s183_s0 = smov 2   ;;  %v88_v45 = vlaneseq }
   0x3   :  { %vm44_vm0 = vcmask 15360   ;;  %s184_s8 = smov 4   ;;  %vm50_vm1 = vcmask 31744   ;;  %s185_s9 = smov 8   ;;  %vm56_vm2 = vcmask 64512   ;;  %vm62_vm3 = vcmask 130048  }
   0x4   :  { %147 = verf.f32 %v11_v1  ;;  %s186_s10 = smov 16   ;;  %s187_s11 = smov 32   ;;  %vm68_vm4 = vcmask 261120   ;;  %vm74_vm5 = vcmask 523264   ;;  %v189_v43 = vmov 1983009808  }
   0x5   :  { %s188_s12 = smov 64   ;;  %v86_v44 = vunpack.c.l.s4 %v189_v43  ;;  %v89_v47 = vshrl.u32 %v88_v45, 7  ;;  %vm119_vm6 = vcmask 1041408   ;;  %vm120_vm7 = vcmask 1043458   ;;  %s190_s13 = smov [#allocation2]  }
   0x6   :  { %vm121_vm8 = vmor %vm120_vm7, %vm119_vm6  ;;  %vm122_vm9 = vcmask 521220   ;;  %s131_s14 = sshll.u32 %s190_s13, 4  ;;  %s132_s14 = int_to_ptr.vmem [resolvable:$true] %s131_s14 }
   0x7   :  { %v87_v46 = vunpack.c.0.s8 %v86_v44  ;;  %vm123_vm10 = vmor %vm122_vm9, %vm121_vm8  ;;  %s159_s15 = scalar_lea.vmem %s132_s14, 224  ;;  %p164_p1 = scmp.lt.s32.totalorder %s132_s14, %s132_s14 }
   0x8   :  { %p160_p0 = scmp.ne.s32.totalorder %s132_s14, %s159_s15  ;;  %p165_p2 = scmp.lt.s32.totalorder %s159_s15, %s159_s15 }
   0x9   :  { %v90_v48 = vsub.s32 %v87_v46, %v89_v47 }
   0xa   :  { %p166_p3 = por %p165_p2, %p164_p1 }
   0xc   :  { %p167_p4 = pnand %p166_p3, %p160_p0 }
   0xe   :  { %v148_v3 = vpop.eup %147 }
   0xf   :  { %v13_v4 = vadd.f32 1.0, %v148_v3 }
  0x11   :  { %v14_v5 = vmul.f32 %v13_v4, %v10_v2 }
  0x13   :  { %v16_v6 = vmul.f32 0.70710677, %v14_v5  ;;  %v15_v7 = vmul.f32 0.5, %v14_v5 }
  0x15   :  { %149 = verf.f32 %v16_v6 }
  0x1f   :  { %v150_v8 = vpop.eup %149 }
  0x20   :  { %v18_v9 = vadd.f32 1.0, %v150_v8 }
  0x22   :  { %v19_v10 = vmul.f32 %v18_v9, %v15_v7 }
  0x24   :  { %v21_v11 = vmul.f32 0.70710677, %v19_v10  ;;  %v20_v12 = vmul.f32 0.5, %v19_v10 }
  0x26   :  { %151 = verf.f32 %v21_v11 }
  0x30   :  { %v152_v13 = vpop.eup %151 }
  0x31   :  { %v23_v14 = vadd.f32 1.0, %v152_v13 }
  0x33   :  { %v24_v15 = vmul.f32 %v23_v14, %v20_v12 }
  0x35   :  { %v26_v16 = vmul.f32 0.70710677, %v24_v15  ;;  %v25_v17 = vmul.f32 0.5, %v24_v15 }
  0x37   :  { %153 = verf.f32 %v26_v16 }
  0x41   :  { %v154_v18 = vpop.eup %153 }
  0x42   :  { %v28_v19 = vadd.f32 1.0, %v154_v18 }
  0x44   :  { %v29_v20 = vmul.f32 %v28_v19, %v25_v17 }
  0x46   :  { %v31_v21 = vmul.f32 0.70710677, %v29_v20  ;;  %v30_v22 = vmul.f32 0.5, %v29_v20 }
  0x48   :  { %155 = verf.f32 %v31_v21 }
  0x52   :  { %v156_v23 = vpop.eup %155 }
  0x53   :  { %v33_v24 = vadd.f32 1.0, %v156_v23 }
  0x55   :  { %v34_v25 = vmul.f32 %v33_v24, %v30_v22 }
  0x57   :  { %v36_v26 = vmul.f32 0.70710677, %v34_v25  ;;  %v35_v27 = vmul.f32 0.5, %v34_v25 }
  0x59   :  { %157 = verf.f32 %v36_v26 }
  0x63   :  { %v158_v28 = vpop.eup %157 }
  0x64   :  { %v38_v29 = vadd.f32 1.0, %v158_v28 }
  0x66   :  { %v39_v30 = vmul.f32 %v38_v29, %v35_v27 }
  0x68   :  { %41 = vrot.lane.b32.xlu0 %v39_v30, %s183_s0 }
  0xda   :  { %v42_v31 = vpop.permute.xlu0 %41 }
  0xdb   :  { %v45_v32 = vsel %vm44_vm0, %v39_v30, %v42_v31 }
  0xdc   :  { %47 = vrot.lane.b32.xlu0 %v45_v32, %s184_s8 }
 0x14e   :  { %v48_v33 = vpop.permute.xlu0 %47 }
 0x14f   :  { %v51_v34 = vsel %vm50_vm1, %v45_v32, %v48_v33 }
 0x150   :  { %53 = vrot.lane.b32.xlu1 %v51_v34, %s185_s9 }
 0x1c2   :  { %v54_v35 = vpop.permute.xlu1 %53 }
 0x1c3   :  { %v57_v36 = vsel %vm56_vm2, %v51_v34, %v54_v35 }
 0x1c4   :  { %59 = vrot.lane.b32.xlu1 %v57_v36, %s186_s10 }
 0x236   :  { %v60_v37 = vpop.permute.xlu1 %59 }
 0x237   :  { %v63_v38 = vsel %vm62_vm3, %v57_v36, %v60_v37 }
 0x238   :  { %65 = vrot.lane.b32.xlu0 %v63_v38, %s187_s11 }
 0x2aa   :  { %v66_v39 = vpop.permute.xlu0 %65 }
 0x2ab   :  { %v69_v40 = vsel %vm68_vm4, %v63_v38, %v66_v39 }
 0x2ac   :  { %71 = vrot.lane.b32.xlu1 %v69_v40, %s188_s12 }
 0x31e   :  { %v72_v41 = vpop.permute.xlu1 %71 }
 0x31f   :  { %v75_v42 = vsel %vm74_vm5, %v69_v40, %v72_v41 }
 0x320   :  { %77 = vrot.lane.b32.xlu0 %v75_v42, %s188_s12 }
 0x392   :  { %v78_v49 = vpop.permute.xlu0 %77 }
 0x393   :  { %v80_v50 = vsel %vm74_vm5, %v69_v40, %v78_v49  ;;  %v84_v51 = vcombine.low %v78_v49, %v78_v49  ;;  %v114_v54 = vrot.slane %v78_v49, %v90_v48 }
 0x394   :  { %v83_v52 = vcombine.low %v80_v50, %v78_v49 }
 0x395   :  { %v98_v53 = vrot.slane %v84_v51, %v90_v48 }
 0x396   :  { %v91_v55 = vrot.slane %v83_v52, %v90_v48 }
 0x397   :  { %v115_v56 = vcombine.low %v98_v53, %v114_v54 }
 0x398   :  { %v99_v57 = vcombine.low %v91_v55, %v98_v53 }
 0x399   :  { %124 = vst.msk [vmem:[#allocation2 + $0x8] sm:$0x3f] %vm123_vm10, %v115_v56 }
 0x39a   :  { %118 = vst [vmem:[#allocation2] sm:$0xff] %v99_v57 }
 0x39b   :  { %170 = shalt.err (!%p167_p4)
}
 0x39c   :  { %s171_s18 = scalar_lea.hbm %s217_s1, 224 }
 0x39d   :  { %p172_p5 = scmp.ne.s32.totalorder %s217_s1, %s171_s18  ;;  %p175_p6 = scmp.lt.u32.totalorder %s171_s18, %s217_s1 }
 0x39f   :  { %p177_p7 = pnand %p175_p6, %p172_p5 }
 0x3a1   :  { %180 = shalt.err (!%p177_p7)
}
 0x3a2   :  { %134 = dma.vmem_to_hbm [thread:$0]  %s132_s14, 224, %s217_s1, [#allocation3]  }
 0x3a3   :  { %181 = dma.done.wait [#allocation3], 224  }
 0x3a4   :  { %182 = vsyncadd [#allocation3], 4294967072 }
 0x3a5   :  { %138 = vsyncpa [#allocation3], 1 }

</bundles_post_ra>
